<compile_context>
chip_gen: v7x
topology: tpu7x:2x2x1
jax: 0.10.0
libtpu: 0.0.40
codegen_flags: <defaults>
</compile_context>

<pallas_src>
import math

import jax
import jax.numpy as jnp
from jax.experimental import pallas as pl
from jax.experimental.pallas import tpu as pltpu


_SMALL_OUTPUT_BYTES = 2 * 1024 * 1024   # below this: single block, single step
_MAX_TH = 64                            # caps one-hot-matmul FLOPs at ~32/byte


def _vmem_capacity_bytes() -> int:
    try:
        info = pltpu.get_tpu_info()
        cap = getattr(info, "vmem_capacity_bytes", None)
        if cap:
            return int(cap)
    except Exception:
        pass
    return 64 * 1024 * 1024             # conservative default (v7x per-core VMEM)


def _choose_row_tile(height, width, dim, itemsize, tile_budget):
    """Pick th (patch-rows per grid step) and the possibly-padded row count.

    Guarantees: (th*width) % sublane == 0 whenever the grid has >1 step (legal
    output block), the output block fits the per-buffer budget, and the grid
    has >= 2 steps once the output exceeds _SMALL_OUTPUT_BYTES (so both v7x
    TensorCores get work).
    """
    total = height * width * dim * itemsize
    if total <= _SMALL_OUTPUT_BYTES:
        return height, height                     # one full-array block
    sub = 16 if itemsize < 4 else 8               # sublane granularity of out dtype
    q = sub // math.gcd(width, sub)               # smallest th with th*width % sub == 0
    th_budget = max(1, tile_budget // max(1, width * dim * itemsize))
    th_cap = max(1, min(th_budget, _MAX_TH, max(1, height // 2)))
    th = max(q, (th_cap // q) * q)
    # Prefer a th that divides height (no padded rows) if one is close by.
    for cand in range(th, max(q - 1, th // 2), -q):
        if height % cand == 0:
            th = cand
            break
    h_pad = -(-height // th) * th                 # ceil(height / th) * th
    return th, h_pad


def _vmem_limit_bytes(out_block_bytes, resident_bytes, vmem_cap):
    # Output + resident inputs double-buffered, plus headroom for the matmul
    # result and compiler-internal scratch.
    needed = 4 * out_block_bytes + 2 * resident_bytes + (8 << 20)
    return int(min(max(needed, 32 << 20), (vmem_cap * 3) // 4))


def _assemble_kernel(h_ref, rmat_ref, wtile_ref, out_ref):
    """One grid step: out_block = R @ H_block + W_tile (single full-width store).

    h_ref:     (1, th, dim)  this step's H rows, right half zero-padded.
    rmat_ref:  (tw, th)      one-hot repeat_interleave matrix (resident).
    wtile_ref: (tw, dim)     tiled W rows in the right half, zeros left (resident).
    out_ref:   (tw, dim)
    """
    left = jnp.dot(rmat_ref[...], h_ref[0],
                   preferred_element_type=jnp.float32,
                   precision=jax.lax.Precision.HIGHEST)
    out_ref[...] = (left + wtile_ref[...]).astype(out_ref.dtype)


def _factorized_pos_embed(h_embed, w_embed, out_dtype=None):
    """pos_embed[h*width + w, :] = concat(H[h], W[w]) assembled by a Pallas kernel."""
    height, d2 = h_embed.shape
    width = w_embed.shape[0]
    dim = 2 * d2
    out_dtype = jnp.dtype(out_dtype) if out_dtype is not None else jnp.dtype(h_embed.dtype)
    itemsize = out_dtype.itemsize

    vmem_cap = _vmem_capacity_bytes()
    tile_budget = max(1 << 20, vmem_cap // 12)     # ~10.6 MiB v5e/v6e, ~5.3 MiB v7x
    th, h_pad = _choose_row_tile(height, width, dim, itemsize, tile_budget)
    grid = h_pad // th
    tw = th * width

    f32 = jnp.float32
    # H rows zero-padded to full `dim` on the right (lane placement baked in),
    # padded to h_pad rows, reshaped so each grid step gets its rows via BlockSpec.
    hpad = jnp.concatenate(
        [h_embed.astype(f32), jnp.zeros((height, d2), f32)], axis=-1)
    if h_pad != height:
        hpad = jnp.pad(hpad, ((0, h_pad - height), (0, 0)))
    hpad = hpad.reshape(grid, th, dim)
    # Tiled W rows in the right half (identical for every block -> resident).
    wtile = jnp.concatenate(
        [jnp.zeros((tw, d2), f32), jnp.tile(w_embed.astype(f32), (th, 1))], axis=-1)
    # One-hot repeat_interleave matrix: block row r selects H row (r // width).
    rmat = jax.nn.one_hot(jnp.arange(tw, dtype=jnp.int32) // width, th, dtype=f32)

    out_block_bytes = tw * dim * itemsize
    resident_bytes = (tw * dim + tw * th + th * dim) * 4

    out = pl.pallas_call(
        _assemble_kernel,
        out_shape=jax.ShapeDtypeStruct((h_pad * width, dim), out_dtype),
        grid=(grid,),
        in_specs=[
            pl.BlockSpec((1, th, dim), lambda i: (i, 0, 0)),   # this step's H rows
            pl.BlockSpec((tw, th), lambda i: (0, 0)),          # resident repeat matrix
            pl.BlockSpec((tw, dim), lambda i: (0, 0)),         # resident tiled W
        ],
        out_specs=pl.BlockSpec((tw, dim), lambda i: (i, 0)),
        compiler_params=pltpu.CompilerParams(
            dimension_semantics=("parallel",),
            vmem_limit_bytes=_vmem_limit_bytes(out_block_bytes, resident_bytes,
                                               vmem_cap)),
    )(hpad, rmat, wtile)

    if h_pad != height:
        out = out[: height * width]
    return out


def _linear_interp_matrix(out_size: int, in_size: int) -> jax.Array:
    # PyTorch bilinear, align_corners=False; the last dim keeps its size so the
    # resize degenerates to 1-D linear interpolation over rows:
    #   src = (dst + 0.5) * in/out - 0.5, clamped.
    i = jnp.arange(out_size, dtype=jnp.float32)
    src = (i + 0.5) * (in_size / out_size) - 0.5
    src = jnp.clip(src, 0.0, float(in_size - 1))
    i0 = jnp.floor(src).astype(jnp.int32)
    i1 = jnp.minimum(i0 + 1, in_size - 1)
    w1 = src - i0.astype(jnp.float32)
    w0 = 1.0 - w1
    return (jax.nn.one_hot(i0, in_size, dtype=jnp.float32) * w0[:, None]
            + jax.nn.one_hot(i1, in_size, dtype=jnp.float32) * w1[:, None])


class FactorizedPositionalEmbedding:
    """JAX/Pallas port of the NaViT FactorizedPositionalEmbedding module."""

    def __init__(self, max_height: int, max_width: int, dim: int, key,
                 out_dtype=None):
        k_h, k_w = jax.random.split(key)
        self.height_embed = jax.random.normal(k_h, (max_height, dim // 2),
                                              dtype=jnp.float32)
        self.width_embed = jax.random.normal(k_w, (max_width, dim // 2),
                                             dtype=jnp.float32)
        self.max_height = max_height
        self.max_width = max_width
        self.dim = dim
        # None -> float32 (matches PyTorch numerics). jnp.bfloat16 halves HBM
        # write traffic on this store-bound kernel if the consumer accepts it.
        self.out_dtype = out_dtype

    def __call__(self, height: int, width: int) -> jax.Array:
        if height > self.max_height or width > self.max_width:
            # PyTorch resizes BOTH tables in this branch. The resize is a tiny
            # (out, in) weight matmul precomputed in plain JAX so the assembly
            # kernel stays one "parallel" pass on every generation.
            h_eff = _linear_interp_matrix(height, self.max_height) @ self.height_embed
            w_eff = _linear_interp_matrix(width, self.max_width) @ self.width_embed
        else:
            h_eff = self.height_embed[:height]
            w_eff = self.width_embed[:width]
        return _factorized_pos_embed(h_eff, w_eff, self.out_dtype)


if __name__ == "__main__":
    key = jax.random.PRNGKey(0)

    # --- case 1: within table bounds (slice + assemble, single block) ---------
    max_height, max_width, dim = 8, 8, 32
    module = FactorizedPositionalEmbedding(max_height, max_width, dim, key)

    height, width = 4, 4
    pos = jax.block_until_ready(module(height, width))
    assert pos.shape == (height * width, dim), pos.shape
    ref = jnp.concatenate(
        [jnp.repeat(module.height_embed[:height], width, axis=0),
         jnp.tile(module.width_embed[:width], (height, 1))], axis=-1)
    assert jnp.allclose(pos, ref, atol=1e-5), "pos-embed mismatch (slice path)"

    # --- case 2: height exceeds max -> interpolation path ---------------------
    h2, w2 = 12, 6
    pos2 = jax.block_until_ready(module(h2, w2))
    assert pos2.shape == (h2 * w2, dim), pos2.shape
    he = _linear_interp_matrix(h2, max_height) @ module.height_embed
    we = _linear_interp_matrix(w2, max_width) @ module.width_embed
    ref2 = jnp.concatenate(
        [jnp.repeat(he, w2, axis=0), jnp.tile(we, (h2, 1))], axis=-1)
    assert jnp.allclose(pos2, ref2, atol=1e-4, rtol=1e-4), \
        "pos-embed mismatch (interp path)"

    # --- case 3: larger output so the multi-step tiled path (grid > 1) runs ---
    module3 = FactorizedPositionalEmbedding(128, 64, 128, jax.random.PRNGKey(1))
    h3, w3 = 100, 48
    pos3 = jax.block_until_ready(module3(h3, w3))
    assert pos3.shape == (h3 * w3, 128), pos3.shape
    ref3 = jnp.concatenate(
        [jnp.repeat(module3.height_embed[:h3], w3, axis=0),
         jnp.tile(module3.width_embed[:w3], (h3, 1))], axis=-1)
    assert jnp.allclose(pos3, ref3, atol=1e-5), "pos-embed mismatch (tiled path)"

    print("KERNEL_OK")
</pallas_src>

<mosaic_0001>
module attributes {stable_mosaic.version = 11 : i64} {
  func.func @_assemble_kernel(%arg0: i32, %arg1: memref<1x4x32xf32, #tpu.memory_space<vmem>>, %arg2: memref<16x4xf32, #tpu.memory_space<vmem>>, %arg3: memref<16x32xf32, #tpu.memory_space<vmem>>, %arg4: memref<16x32xf32, #tpu.memory_space<vmem>>) attributes {dimension_semantics = [#tpu.dimension_semantics<parallel>], iteration_bounds = array<i64: 1>, scalar_prefetch = 0 : i64, scratch_operands = 0 : i64, tpu.core_type = #tpu.core_type<tc>, window_params = [{transform_indices = @transform_0, window_bounds = array<i64: 1, 4, 32>}, {pipeline_mode = #tpu.pipeline_mode<synchronous>, transform_indices = @transform_1, window_bounds = array<i64: 16, 4>}, {pipeline_mode = #tpu.pipeline_mode<synchronous>, transform_indices = @transform_2, window_bounds = array<i64: 16, 32>}, {transform_indices = @transform_3, window_bounds = array<i64: 16, 32>}]} {
    %c0 = arith.constant 0 : index
    %c0_0 = arith.constant 0 : index
    %0 = vector.load %arg2[%c0, %c0_0] : memref<16x4xf32, #tpu.memory_space<vmem>>, vector<16x4xf32>
    %c0_1 = arith.constant 0 : index
    %c0_2 = arith.constant 0 : index
    %c0_3 = arith.constant 0 : index
    %1 = vector.load %arg1[%c0_1, %c0_2, %c0_3] : memref<1x4x32xf32, #tpu.memory_space<vmem>>, vector<1x4x32xf32>
    %2 = vector.shape_cast %1 : vector<1x4x32xf32> to vector<4x32xf32>
    %cst = arith.constant dense<0.000000e+00> : vector<16x32xf32>
    %3 = tpu.matmul %0, %2, %cst {dimension_numbers = #tpu.dot_dimension_numbers<[1], [0], [0], [1], [0, 0, 1, 1], [], []>, precision = #tpu.contract_precision<fp32>} : vector<16x4xf32>, vector<4x32xf32>, vector<16x32xf32> -> vector<16x32xf32>
    %c0_4 = arith.constant 0 : index
    %c0_5 = arith.constant 0 : index
    %4 = vector.load %arg3[%c0_4, %c0_5] : memref<16x32xf32, #tpu.memory_space<vmem>>, vector<16x32xf32>
    %5 = arith.addf %3, %4 : vector<16x32xf32>
    %c0_6 = arith.constant 0 : index
    %c0_7 = arith.constant 0 : index
    %6 = vector.load %arg4[%c0_6, %c0_7] : memref<16x32xf32, #tpu.memory_space<vmem>>, vector<16x32xf32>
    tpu.vector_store %arg4[%c0_6, %c0_7], %5 {strides = array<i32>} : memref<16x32xf32, #tpu.memory_space<vmem>>, vector<16x32xf32>,
    return
  }
  func.func @transform_0(%arg0: i32) -> (i32, i32, i32) {
    %c0_i32 = arith.constant 0 : i32
    %c0_i32_0 = arith.constant 0 : i32
    %c0_i32_1 = arith.constant 0 : i32
    return %arg0, %c0_i32, %c0_i32_0 : i32, i32, i32
  }
  func.func @transform_1(%arg0: i32) -> (i32, i32) {
    %c0_i32 = arith.constant 0 : i32
    %c0_i32_0 = arith.constant 0 : i32
    %c0_i32_1 = arith.constant 0 : i32
    return %c0_i32, %c0_i32_0 : i32, i32
  }
  func.func @transform_2(%arg0: i32) -> (i32, i32) {
    %c0_i32 = arith.constant 0 : i32
    %c0_i32_0 = arith.constant 0 : i32
    %c0_i32_1 = arith.constant 0 : i32
    return %c0_i32, %c0_i32_0 : i32, i32
  }
  func.func @transform_3(%arg0: i32) -> (i32, i32) {
    %c0_i32 = arith.constant 0 : i32
    %c0_i32_0 = arith.constant 0 : i32
    return %arg0, %c0_i32 : i32, i32
  }
}

</mosaic_0001>

<bundles_post_ra>
// kernel: tpu_custom_call.1
= control target key start
LH: loop header
LB: loop body
LE: loop exit
PB: predicated region body
PF: predicated region fallthrough
CT: control target
= control target key end

     0   :  { %vm27_vm0 = vcmask 1043456   ;;  %vm20_vm1 = vcmask 31744   ;;  %s676_s0 = inlined_call_operand.vmem [shape: f32[1,4,32], index: 0, kind: input, shape index: {}]   ;;  %s677_s1 = inlined_call_operand.vmem [shape: f32[16,4], index: 1, kind: input, shape index: {}]   ;;  %s678_s2 = inlined_call_operand.vmem [shape: f32[16,32], index: 2, kind: input, shape index: {}]   ;;  %s679_s3 = inlined_call_operand.hbm [shape: f32[16,32], index: 3, kind: output, shape index: {}]  }
   0x1   :  { %v17_v0 = vld [vmem:[%s676_s0] sm:$0xf]  ;;  %v16_v2 = vld [vmem:[%s677_s1 + $0x8] sm:$0xff] }
   0x2   :  { %v15_v1 = vld [vmem:[%s677_s1] sm:$0xff]  ;;  %v29_v3 = vsel %vm27_vm0, %v17_v0, 0  ;;  %v25_v5 = vsel %vm20_vm1, %v16_v2, 0 }
   0x3   :  { %v22_v4 = vsel %vm20_vm1, %v15_v1, 0 }
   0x4   :  { %8 = vsyncpa [#allocation3], 0  ;;  %v32_v6 = vand.u32 4294901760, %v29_v3  ;;  %v97_v7 = vand.u32 4294901760, %v22_v4  ;;  %v107_v8 = vand.u32 4294901760, %v25_v5  ;;  %v19_v23 = vld [vmem:[%s678_s2 + $0x8] sm:$0xff] }
   0x5   :  { %v18_v24 = vld [vmem:[%s678_s2] sm:$0xff]  ;;  %s626_s20 = smov [#allocation2]   ;;  %vm520_vm2 = vcmask 261120  }
   0x6   :  { %572 = vmatprep.subr.mxu0 %v32_v6  ;;  %v98_v9 = vsub.f32 %v22_v4, %v97_v7  ;;  %v108_v10 = vsub.f32 %v25_v5, %v107_v8  ;;  %557 = vmatprep.subr.mxu1 %v32_v6  ;;  %v119_v11 = vsub.f32 %v29_v3, %v32_v6  ;;  %s528_s21 = sshll.u32 %s626_s20, 4  ;;  %s529_s21 = int_to_ptr.vmem [resolvable:$true] %s528_s21 }
   0x7   :  { %573 = vmatpush3.msra.mxu0 %v32_v6  ;;  %558 = vmatpush3.msra.mxu1 %v32_v6  ;;  %s602_s22 = scalar_lea.vmem %s529_s21, 256  ;;  %p607_p1 = scmp.lt.s32.totalorder %s529_s21, %s529_s21 }
   0x8   :  { %v99_v12 = vand.u32 4294901760, %v98_v9  ;;  %v109_v13 = vand.u32 4294901760, %v108_v10  ;;  %v120_v14 = vand.u32 4294901760, %v119_v11  ;;  %p603_p0 = scmp.ne.s32.totalorder %s529_s21, %s602_s22  ;;  %p608_p2 = scmp.lt.s32.totalorder %s602_s22, %s602_s22 }
   0xa   :  { %574 = vmatprep.mubr.f32.mxu0 %v99_v12  ;;  %v100_v15 = vsub.f32 %v98_v9, %v99_v12  ;;  %v121_v16 = vsub.f32 %v119_v11, %v120_v14  ;;  %v110_v17 = vsub.f32 %v108_v10, %v109_v13  ;;  %577 = vmatprep.subr.mxu0 %v120_v14  ;;  %p609_p3 = por %p608_p2, %p607_p1 }
   0xb   :  { %575 = vmatmul.mubr.f32.vlgmr.msra.gmra.mrb[0].mxu0 %v109_v13 }
   0xc   :  { %v101_v18 = vand.u32 4294901760, %v100_v15  ;;  %v122_v19 = vand.u32 4294901760, %v121_v16  ;;  %v111_v20 = vand.u32 4294901760, %v110_v17  ;;  %578 = vmatpush3.msra.mxu0 %v120_v14  ;;  %579 = vmatprep.mubr.f32.mxu0 %v97_v7  ;;  %p610_p4 = pnand %p609_p3, %p603_p0 }
   0xd   :  { %582 = vmatprep.subr.mxu0 %v32_v6 }
   0xe   :  { %559 = vmatprep.mubr.f32.mxu1 %v101_v18  ;;  %562 = vmatprep.subr.mxu1 %v122_v19 }
   0xf   :  { %560 = vmatmul.mubr.f32.vlgmr.msra.gmra.mrb[0].mxu1 %v111_v20 }
  0x10   :  { %563 = vmatpush3.msra.mxu1 %v122_v19  ;;  %564 = vmatprep.mubr.f32.mxu1 %v97_v7 }
  0x11   :  { %567 = vmatprep.subr.mxu1 %v119_v11 }
  0x13   :  { %580 = vmatmul.mubr.f32.vlgmr.msra.gmra.mrb[0].mxu0 %v107_v8 }
  0x14   :  { %583 = vmatpush3.msra.mxu0 %v32_v6  ;;  %584 = vmatprep.mubr.f32.mxu0 %v97_v7 }
  0x17   :  { %565 = vmatmul.mubr.f32.vlgmr.msra.gmra.mrb[0].mxu1 %v107_v8 }
  0x18   :  { %568 = vmatpush3.msra.mxu1 %v119_v11  ;;  %569 = vmatprep.mubr.f32.mxu1 %v98_v9 }
  0x1b   :  { %585 = vmatmul.mubr.f32.vlgmr.msra.gmra.mrb[0].mxu0 %v107_v8 }
  0x1f   :  { %570 = vmatmul.mubr.f32.vlgmr.msra.gmra.mrb[0].mxu1 %v108_v10 }
  0xee   :  { %v586_v21 = vpop.f32.mrb[0].mxu0 }
  0xef   :  { %v510_v22 = vpop.f32.mrb[1].mxu0 }
  0xf2   :  { %v571_v25 = vpop.f32.mrb[0].mxu1 }
  0xf3   :  { %v587_v26 = vadd.f32 %v571_v25, %v19_v23  ;;  %v269_v27 = vpop.f32.mrb[1].mxu1 }
  0xf4   :  { %v589_v28 = vadd.f32 %v269_v27, %v18_v24 }
  0xf5   :  { %v588_v29 = vadd.f32 %v587_v26, %v586_v21 }
  0xf6   :  { %v590_v30 = vadd.f32 %v589_v28, %v510_v22 }
  0xf7   :  { %522 = vst.msk [vmem:[#allocation2 + $0x8] sm:$0xff] %vm520_vm2, %v588_v29 }
  0xf8   :  { %521 = vst.msk [vmem:[#allocation2] sm:$0xff] %vm520_vm2, %v590_v30 }
  0xf9   :  { %613 = shalt.err (!%p610_p4)
}
  0xfa   :  { %s614_s24 = scalar_lea.hbm %s679_s3, 256 }
  0xfb   :  { %p615_p5 = scmp.ne.s32.totalorder %s679_s3, %s614_s24  ;;  %p618_p6 = scmp.lt.u32.totalorder %s614_s24, %s679_s3 }
  0xfd   :  { %p620_p7 = pnand %p618_p6, %p615_p5 }
  0xff   :  { %623 = shalt.err (!%p620_p7)
}
 0x100   :  { %s627_s29 = smov 128   ;;  %s628_s30 = smov 8  }
 0x101   :  { %534 = dma.vmem_to_hbm [thread:$0]  %s529_s21, 256, %s679_s3, [#allocation3], %s627_s29, %s627_s29, %s628_s30  }
 0x102   :  { %624 = dma.done.wait [#allocation3], 256  }
 0x103   :  { %625 = vsyncadd [#allocation3], 4294967040 }
 0x104   :  { %538 = vsyncpa [#allocation3], 1 }

</bundles_post_ra>
